<compile_context>
chip_gen: v7x
topology: tpu7x:2x2x1
jax: 0.10.0
libtpu: 0.0.40
codegen_flags: <defaults>
</compile_context>

<pallas_src>
import functools

import numpy as np
import jax
import jax.numpy as jnp
from jax import lax
from jax.experimental import pallas as pl
from jax.experimental.pallas import tpu as pltpu


def _concat_cbr_kernel(x_ref, w_ref, b_ref, mask_ref, out_ref, slab_ref, *, W):
    """One batch element per grid step, channel-major / flattened-spatial.

    x_ref    : (1, C, HW)    input, HW = H*W on the lane axis
    w_ref    : (C, 9*C)      folded conv weights, tap-major columns
    b_ref    : (C, 1)        folded bias
    mask_ref : (9, HW)       per-tap validity mask (1.0 inside image, 0.0 halo)
    out_ref  : (1, 2*C, HW)  [x | relu(conv_bn(x))] along channels
    slab_ref : (9*C, HW)     VMEM scratch: im2col slab
    """
    C = x_ref.shape[1]
    HW = x_ref.shape[2]
    xf = x_ref[0]                                    # (C, HW)

    # Build the im2col slab: rows tap*C .. tap*C+C-1 hold x shifted by the
    # tap offset (XLU roll along lanes), out-of-image taps zeroed by the mask.
    for ky in range(3):
        for kx in range(3):
            tap = ky * 3 + kx
            off = (ky - 1) * W + (kx - 1)            # flat source offset
            if off == 0:
                piece = xf                           # center tap: no shift/mask
            else:
                sh = (-off) % HW
                shifted = pltpu.roll(xf, shift=sh, axis=1)      # XLU rotate
                piece = shifted * mask_ref[pl.ds(tap, 1), :]    # (C,HW)*(1,HW)
            slab_ref[pl.ds(tap * C, C), :] = piece

    # One fused MXU matmul: (C, 9C) @ (9C, HW) -> (C, HW), f32 accumulate.
    conv = jnp.dot(w_ref[...], slab_ref[...],
                   preferred_element_type=jnp.float32)
    conv = jnp.maximum(conv + b_ref[...], 0.0)       # bias + ReLU

    # Channel concat: both halves are lane-dense stores (last dim = HW).
    out_ref[0, :C, :] = xf
    out_ref[0, C:, :] = conv.astype(out_ref.dtype)


def _tap_masks(H, W):
    """(9, H*W) f32: 1.0 where the 3x3 tap reads inside the image, else 0.0."""
    m = np.zeros((9, H, W), np.float32)
    hh = np.arange(H)[:, None]
    ww = np.arange(W)[None, :]
    for ky in range(3):
        for kx in range(3):
            ok = ((hh + ky - 1 >= 0) & (hh + ky - 1 < H) &
                  (ww + kx - 1 >= 0) & (ww + kx - 1 < W))
            m[ky * 3 + kx] = ok.astype(np.float32)
    return jnp.asarray(m.reshape(9, H * W))


def concat_block_forward(x_nchw, w_mat, b_col):
    """x_nchw: (N, C, H, W) f32; w_mat: (C, 9C); b_col: (C, 1). Returns (N, 2C, H, W)."""
    N, C, H, W = x_nchw.shape
    HW = H * W
    xf = x_nchw.reshape(N, C, HW)          # free reshape: no transpose, no pad
    masks = _tap_masks(H, W)               # numpy-built -> constant under jit

    itemsize = jnp.dtype(x_nchw.dtype).itemsize
    block_bytes = (C * HW + 2 * C * HW) * itemsize          # x + out per step
    const_bytes = (C * 9 * C + C + 9 * HW) * 4              # w, b, masks
    scratch_bytes = 9 * C * HW * 4                          # im2col slab
    vmem_limit = int(min(96 * 2**20,
                         max(16 * 2**20,
                             4 * (2 * block_bytes + 2 * const_bytes
                                  + scratch_bytes))))

    out = pl.pallas_call(
        functools.partial(_concat_cbr_kernel, W=W),
        out_shape=jax.ShapeDtypeStruct((N, 2 * C, HW), x_nchw.dtype),
        grid_spec=pltpu.PrefetchScalarGridSpec(
            num_scalar_prefetch=0,
            grid=(N,),
            in_specs=[
                pl.BlockSpec((1, C, HW), lambda n: (n, 0, 0)),
                pl.BlockSpec((C, 9 * C), lambda n: (0, 0)),
                pl.BlockSpec((C, 1), lambda n: (0, 0)),
                pl.BlockSpec((9, HW), lambda n: (0, 0)),
            ],
            out_specs=pl.BlockSpec((1, 2 * C, HW), lambda n: (n, 0, 0)),
            scratch_shapes=[pltpu.VMEM((9 * C, HW), jnp.float32)],
        ),
        compiler_params=pltpu.CompilerParams(
            dimension_semantics=("parallel",),
            vmem_limit_bytes=vmem_limit),
    )(xf, w_mat, b_col, masks)

    return out.reshape(N, 2 * C, H, W)


def _make_params(key, C):
    """Deterministic conv + BN params, folded into (C, 9C) weight + (C, 1) bias."""
    k1, k2, k3, k4, k5, k6 = jax.random.split(key, 6)
    # Conv2d(C, C, 3, padding=1) weight: (C_out, C_in, 3, 3) ; bias: (C,)
    w = jax.random.normal(k1, (C, C, 3, 3), jnp.float32) * 0.1
    b = jax.random.normal(k2, (C,), jnp.float32) * 0.1
    # BatchNorm2d(C) eval-mode parameters
    gamma = 1.0 + 0.1 * jax.random.normal(k3, (C,), jnp.float32)
    beta = 0.1 * jax.random.normal(k4, (C,), jnp.float32)
    running_mean = 0.1 * jax.random.normal(k5, (C,), jnp.float32)
    running_var = 1.0 + 0.1 * jax.random.uniform(k6, (C,), jnp.float32)
    eps = 1e-5

    scale = gamma / jnp.sqrt(running_var + eps)                 # (C,)
    w_fold = w * scale[:, None, None, None]                     # (C_out, C_in, 3, 3)
    b_fold = (b - running_mean) * scale + beta                  # (C,)

    # (C_out, C_in, ky, kx) -> (C_out, ky, kx, C_in) -> (C_out, 9*C_in)
    w_mat = jnp.transpose(w_fold, (0, 2, 3, 1)).reshape(C, 9 * C)
    return w_mat, b_fold[:, None], w_fold, b_fold


def _reference(x_nchw, w_fold, b_fold):
    """Pure-JAX reference: conv(NCHW, folded BN) -> ReLU -> concat."""
    y = lax.conv_general_dilated(
        x_nchw, w_fold, window_strides=(1, 1), padding=((1, 1), (1, 1)),
        dimension_numbers=("NCHW", "OIHW", "NCHW"))
    y = jnp.maximum(y + b_fold[None, :, None, None], 0.0)
    return jnp.concatenate([x_nchw, y], axis=1)


if __name__ == "__main__":
    key = jax.random.PRNGKey(0)
    kx, kp = jax.random.split(key)

    N, C, H, W = 2, 4, 16, 16
    x = jax.random.normal(kx, (N, C, H, W), jnp.float32)

    w_mat, b_col, w_fold, b_fold = _make_params(kp, C)

    out = concat_block_forward(x, w_mat, b_col)
    out = jax.block_until_ready(out)

    ref = _reference(x, w_fold, b_fold)
    assert out.shape == (N, 2 * C, H, W)
    assert jnp.allclose(out, ref, atol=1e-4, rtol=1e-4), (
        float(jnp.max(jnp.abs(out - ref))))

    print("KERNEL_OK")
</pallas_src>

<mosaic_0001>
module attributes {stable_mosaic.version = 11 : i64} {
  func.func @_concat_cbr_kernel(%arg0: i32, %arg1: memref<1x4x256xf32, #tpu.memory_space<vmem>>, %arg2: memref<4x36xf32, #tpu.memory_space<vmem>>, %arg3: memref<4x1xf32, #tpu.memory_space<vmem>>, %arg4: memref<9x256xf32, #tpu.memory_space<vmem>>, %arg5: memref<1x8x256xf32, #tpu.memory_space<vmem>>, %arg6: memref<36x256xf32, #tpu.memory_space<vmem>>) attributes {dimension_semantics = [#tpu.dimension_semantics<parallel>], iteration_bounds = array<i64: 2>, scalar_prefetch = 0 : i64, scratch_operands = 1 : i64, tpu.core_type = #tpu.core_type<tc>, window_params = [{transform_indices = @transform_0, window_bounds = array<i64: 1, 4, 256>}, {pipeline_mode = #tpu.pipeline_mode<synchronous>, transform_indices = @transform_1, window_bounds = array<i64: 4, 36>}, {pipeline_mode = #tpu.pipeline_mode<synchronous>, transform_indices = @transform_2, window_bounds = array<i64: 4, 1>}, {pipeline_mode = #tpu.pipeline_mode<synchronous>, transform_indices = @transform_3, window_bounds = array<i64: 9, 256>}, {transform_indices = @transform_4, window_bounds = array<i64: 1, 8, 256>}]} {
    %c0 = arith.constant 0 : index
    %c0_0 = arith.constant 0 : index
    %c0_1 = arith.constant 0 : index
    %0 = vector.load %arg1[%c0, %c0_0, %c0_1] : memref<1x4x256xf32, #tpu.memory_space<vmem>>, vector<1x4x256xf32>
    %1 = vector.shape_cast %0 : vector<1x4x256xf32> to vector<4x256xf32>
    %c17_i32 = arith.constant 17 : i32
    %2 = tpu.dynamic_rotate %1 by %c17_i32 dim 1 : vector<4x256xf32>, i32 -> vector<4x256xf32>
    %c0_2 = arith.constant 0 : index
    %c0_3 = arith.constant 0 : index
    %3 = vector.load %arg4[%c0_2, %c0_3] : memref<9x256xf32, #tpu.memory_space<vmem>>, vector<1x256xf32>
    %4 = vector.broadcast %3 : vector<1x256xf32> to vector<4x256xf32>
    %5 = arith.mulf %2, %4 : vector<4x256xf32>
    %c0_4 = arith.constant 0 : index
    %c0_5 = arith.constant 0 : index
    %6 = vector.load %arg6[%c0_4, %c0_5] : memref<36x256xf32, #tpu.memory_space<vmem>>, vector<4x256xf32>
    tpu.vector_store %arg6[%c0_4, %c0_5], %5 {strides = array<i32>} : memref<36x256xf32, #tpu.memory_space<vmem>>, vector<4x256xf32>,
    %c16_i32 = arith.constant 16 : i32
    %7 = tpu.dynamic_rotate %1 by %c16_i32 dim 1 : vector<4x256xf32>, i32 -> vector<4x256xf32>
    %c1 = arith.constant 1 : index
    %c0_6 = arith.constant 0 : index
    %8 = vector.load %arg4[%c1, %c0_6] : memref<9x256xf32, #tpu.memory_space<vmem>>, vector<1x256xf32>
    %9 = vector.broadcast %8 : vector<1x256xf32> to vector<4x256xf32>
    %10 = arith.mulf %7, %9 : vector<4x256xf32>
    %c4 = arith.constant 4 : index
    %c0_7 = arith.constant 0 : index
    %11 = vector.load %arg6[%c4, %c0_7] : memref<36x256xf32, #tpu.memory_space<vmem>>, vector<4x256xf32>
    tpu.vector_store %arg6[%c4, %c0_7], %10 {strides = array<i32>} : memref<36x256xf32, #tpu.memory_space<vmem>>, vector<4x256xf32>,
    %c15_i32 = arith.constant 15 : i32
    %12 = tpu.dynamic_rotate %1 by %c15_i32 dim 1 : vector<4x256xf32>, i32 -> vector<4x256xf32>
    %c2 = arith.constant 2 : index
    %c0_8 = arith.constant 0 : index
    %13 = vector.load %arg4[%c2, %c0_8] : memref<9x256xf32, #tpu.memory_space<vmem>>, vector<1x256xf32>
    %14 = vector.broadcast %13 : vector<1x256xf32> to vector<4x256xf32>
    %15 = arith.mulf %12, %14 : vector<4x256xf32>
    %c8 = arith.constant 8 : index
    %c0_9 = arith.constant 0 : index
    %16 = vector.load %arg6[%c8, %c0_9] : memref<36x256xf32, #tpu.memory_space<vmem>>, vector<4x256xf32>
    tpu.vector_store %arg6[%c8, %c0_9], %15 {strides = array<i32>} : memref<36x256xf32, #tpu.memory_space<vmem>>, vector<4x256xf32>,
    %c1_i32 = arith.constant 1 : i32
    %17 = tpu.dynamic_rotate %1 by %c1_i32 dim 1 : vector<4x256xf32>, i32 -> vector<4x256xf32>
    %c3 = arith.constant 3 : index
    %c0_10 = arith.constant 0 : index
    %18 = vector.load %arg4[%c3, %c0_10] : memref<9x256xf32, #tpu.memory_space<vmem>>, vector<1x256xf32>
    %19 = vector.broadcast %18 : vector<1x256xf32> to vector<4x256xf32>
    %20 = arith.mulf %17, %19 : vector<4x256xf32>
    %c12 = arith.constant 12 : index
    %c0_11 = arith.constant 0 : index
    %21 = vector.load %arg6[%c12, %c0_11] : memref<36x256xf32, #tpu.memory_space<vmem>>, vector<4x256xf32>
    tpu.vector_store %arg6[%c12, %c0_11], %20 {strides = array<i32>} : memref<36x256xf32, #tpu.memory_space<vmem>>, vector<4x256xf32>,
    %c16 = arith.constant 16 : index
    %c0_12 = arith.constant 0 : index
    %22 = vector.load %arg6[%c16, %c0_12] : memref<36x256xf32, #tpu.memory_space<vmem>>, vector<4x256xf32>
    tpu.vector_store %arg6[%c16, %c0_12], %1 {strides = array<i32>} : memref<36x256xf32, #tpu.memory_space<vmem>>, vector<4x256xf32>,
    %c255_i32 = arith.constant 255 : i32
    %23 = tpu.dynamic_rotate %1 by %c255_i32 dim 1 : vector<4x256xf32>, i32 -> vector<4x256xf32>
    %c5 = arith.constant 5 : index
    %c0_13 = arith.constant 0 : index
    %24 = vector.load %arg4[%c5, %c0_13] : memref<9x256xf32, #tpu.memory_space<vmem>>, vector<1x256xf32>
    %25 = vector.broadcast %24 : vector<1x256xf32> to vector<4x256xf32>
    %26 = arith.mulf %23, %25 : vector<4x256xf32>
    %c20 = arith.constant 20 : index
    %c0_14 = arith.constant 0 : index
    %27 = vector.load %arg6[%c20, %c0_14] : memref<36x256xf32, #tpu.memory_space<vmem>>, vector<4x256xf32>
    tpu.vector_store %arg6[%c20, %c0_14], %26 {strides = array<i32>} : memref<36x256xf32, #tpu.memory_space<vmem>>, vector<4x256xf32>,
    %c241_i32 = arith.constant 241 : i32
    %28 = tpu.dynamic_rotate %1 by %c241_i32 dim 1 : vector<4x256xf32>, i32 -> vector<4x256xf32>
    %c6 = arith.constant 6 : index
    %c0_15 = arith.constant 0 : index
    %29 = vector.load %arg4[%c6, %c0_15] : memref<9x256xf32, #tpu.memory_space<vmem>>, vector<1x256xf32>
    %30 = vector.broadcast %29 : vector<1x256xf32> to vector<4x256xf32>
    %31 = arith.mulf %28, %30 : vector<4x256xf32>
    %c24 = arith.constant 24 : index
    %c0_16 = arith.constant 0 : index
    %32 = vector.load %arg6[%c24, %c0_16] : memref<36x256xf32, #tpu.memory_space<vmem>>, vector<4x256xf32>
    tpu.vector_store %arg6[%c24, %c0_16], %31 {strides = array<i32>} : memref<36x256xf32, #tpu.memory_space<vmem>>, vector<4x256xf32>,
    %c240_i32 = arith.constant 240 : i32
    %33 = tpu.dynamic_rotate %1 by %c240_i32 dim 1 : vector<4x256xf32>, i32 -> vector<4x256xf32>
    %c7 = arith.constant 7 : index
    %c0_17 = arith.constant 0 : index
    %34 = vector.load %arg4[%c7, %c0_17] : memref<9x256xf32, #tpu.memory_space<vmem>>, vector<1x256xf32>
    %35 = vector.broadcast %34 : vector<1x256xf32> to vector<4x256xf32>
    %36 = arith.mulf %33, %35 : vector<4x256xf32>
    %c28 = arith.constant 28 : index
    %c0_18 = arith.constant 0 : index
    %37 = vector.load %arg6[%c28, %c0_18] : memref<36x256xf32, #tpu.memory_space<vmem>>, vector<4x256xf32>
    tpu.vector_store %arg6[%c28, %c0_18], %36 {strides = array<i32>} : memref<36x256xf32, #tpu.memory_space<vmem>>, vector<4x256xf32>,
    %c239_i32 = arith.constant 239 : i32
    %38 = tpu.dynamic_rotate %1 by %c239_i32 dim 1 : vector<4x256xf32>, i32 -> vector<4x256xf32>
    %c8_19 = arith.constant 8 : index
    %c0_20 = arith.constant 0 : index
    %39 = vector.load %arg4[%c8_19, %c0_20] : memref<9x256xf32, #tpu.memory_space<vmem>>, vector<1x256xf32>
    %40 = vector.broadcast %39 : vector<1x256xf32> to vector<4x256xf32>
    %41 = arith.mulf %38, %40 : vector<4x256xf32>
    %c32 = arith.constant 32 : index
    %c0_21 = arith.constant 0 : index
    %42 = vector.load %arg6[%c32, %c0_21] : memref<36x256xf32, #tpu.memory_space<vmem>>, vector<4x256xf32>
    tpu.vector_store %arg6[%c32, %c0_21], %41 {strides = array<i32>} : memref<36x256xf32, #tpu.memory_space<vmem>>, vector<4x256xf32>,
    %c0_22 = arith.constant 0 : index
    %c0_23 = arith.constant 0 : index
    %43 = vector.load %arg2[%c0_22, %c0_23] : memref<4x36xf32, #tpu.memory_space<vmem>>, vector<4x36xf32>
    %c0_24 = arith.constant 0 : index
    %c0_25 = arith.constant 0 : index
    %44 = vector.load %arg6[%c0_24, %c0_25] : memref<36x256xf32, #tpu.memory_space<vmem>>, vector<36x256xf32>
    %cst = arith.constant dense<0.000000e+00> : vector<4x256xf32>
    %45 = tpu.matmul %43, %44, %cst {dimension_numbers = #tpu.dot_dimension_numbers<[1], [0], [0], [1], [0, 0, 1, 1], [], []>} : vector<4x36xf32>, vector<36x256xf32>, vector<4x256xf32> -> vector<4x256xf32>
    %c0_26 = arith.constant 0 : index
    %c0_27 = arith.constant 0 : index
    %46 = vector.load %arg3[%c0_26, %c0_27] : memref<4x1xf32, #tpu.memory_space<vmem>>, vector<4x1xf32>
    %47 = vector.broadcast %46 : vector<4x1xf32> to vector<4x256xf32>
    %48 = arith.addf %45, %47 : vector<4x256xf32>
    %cst_28 = arith.constant 0.000000e+00 : f32
    %49 = vector.broadcast %cst_28 : f32 to vector<4x256xf32>
    %50 = arith.maximumf %48, %49 : vector<4x256xf32>
    %c0_29 = arith.constant 0 : index
    %c0_30 = arith.constant 0 : index
    %c0_31 = arith.constant 0 : index
    %51 = vector.load %arg5[%c0_29, %c0_30, %c0_31] : memref<1x8x256xf32, #tpu.memory_space<vmem>>, vector<1x4x256xf32>
    %52 = vector.shape_cast %51 : vector<1x4x256xf32> to vector<4x256xf32>
    %53 = vector.shape_cast %1 : vector<4x256xf32> to vector<1x4x256xf32>
    tpu.vector_store %arg5[%c0_29, %c0_30, %c0_31], %53 {strides = array<i32>} : memref<1x8x256xf32, #tpu.memory_space<vmem>>, vector<1x4x256xf32>,
    %c0_32 = arith.constant 0 : index
    %c4_33 = arith.constant 4 : index
    %c0_34 = arith.constant 0 : index
    %54 = vector.load %arg5[%c0_32, %c4_33, %c0_34] : memref<1x8x256xf32, #tpu.memory_space<vmem>>, vector<1x4x256xf32>
    %55 = vector.shape_cast %54 : vector<1x4x256xf32> to vector<4x256xf32>
    %56 = vector.shape_cast %50 : vector<4x256xf32> to vector<1x4x256xf32>
    tpu.vector_store %arg5[%c0_32, %c4_33, %c0_34], %56 {strides = array<i32>} : memref<1x8x256xf32, #tpu.memory_space<vmem>>, vector<1x4x256xf32>,
    return
  }
  func.func @transform_0(%arg0: i32) -> (i32, i32, i32) {
    %c0_i32 = arith.constant 0 : i32
    %c0_i32_0 = arith.constant 0 : i32
    %c0_i32_1 = arith.constant 0 : i32
    return %arg0, %c0_i32, %c0_i32_0 : i32, i32, i32
  }
  func.func @transform_1(%arg0: i32) -> (i32, i32) {
    %c0_i32 = arith.constant 0 : i32
    %c0_i32_0 = arith.constant 0 : i32
    %c0_i32_1 = arith.constant 0 : i32
    return %c0_i32, %c0_i32_0 : i32, i32
  }
  func.func @transform_2(%arg0: i32) -> (i32, i32) {
    %c0_i32 = arith.constant 0 : i32
    %c0_i32_0 = arith.constant 0 : i32
    %c0_i32_1 = arith.constant 0 : i32
    return %c0_i32, %c0_i32_0 : i32, i32
  }
  func.func @transform_3(%arg0: i32) -> (i32, i32) {
    %c0_i32 = arith.constant 0 : i32
    %c0_i32_0 = arith.constant 0 : i32
    %c0_i32_1 = arith.constant 0 : i32
    return %c0_i32, %c0_i32_0 : i32, i32
  }
  func.func @transform_4(%arg0: i32) -> (i32, i32, i32) {
    %c0_i32 = arith.constant 0 : i32
    %c0_i32_0 = arith.constant 0 : i32
    %c0_i32_1 = arith.constant 0 : i32
    return %arg0, %c0_i32, %c0_i32_0 : i32, i32, i32
  }
}

</mosaic_0001>

<bundles_post_ra>
// kernel: tpu_custom_call.1
= control target key start
LH: loop header
LB: loop body
LE: loop exit
PB: predicated region body
PF: predicated region fallthrough
CT: control target
= control target key end

     0   :  { %9 = vsyncpa [#allocation4], 0  ;;  %s1184_s0 = inlined_call_operand.hbm [shape: f32[2,4,256], index: 0, kind: input, shape index: {}]   ;;  %s1185_s1 = inlined_call_operand.vmem [shape: f32[4,36], index: 1, kind: input, shape index: {}]   ;;  %s1186_s2 = inlined_call_operand.vmem [shape: f32[4,1], index: 2, kind: input, shape index: {}]   ;;  %s1187_s3 = inlined_call_operand.hbm [shape: f32[9,256], index: 3, kind: input, shape index: {}]   ;;  %s1188_s4 = inlined_call_operand.hbm [shape: f32[2,8,256], index: 4, kind: output, shape index: {}]  }
   0x1   :  { %11 = vsyncpa [#allocation4 + $0x1], 0 }
   0x2   :  { %12 = vsyncpa [#allocation7], 0 }
   0x3   :  { %13 = vsyncpa [#allocation5], 0 }
   0x4   :  { %15 = vsyncpa [#allocation5 + $0x1], 0  ;;  %s928_s15 = smov 0   ;;  %s930_s16 = smov 0  }
   0x5   :  { %s932_s17 = smov 0   ;;  %s934_s18 = smov 0  }
   0x6 LB: > { %s949_s19 = sadd.s32 4294967295, %s886_s18   ;;  %s658_s20 = sadd.s32 4294967294, %s886_s18   ;;  %s886_s18 = sphi %s934_s18, %s1208_s18   ;;  %s882_s17 = sphi %s932_s17, %s1207_s17   ;;  %s878_s16 = sphi %s930_s16, %s1206_s16   ;;  %s874_s15 = sphi %s928_s15, %s1205_s15  }
   0x7   : > { %p41_p0 = scmp.ne.s32.totalorder %s878_s16, %s874_s15  ;;  %p1189_p1 = scmp.eq.s32.totalorder %s949_s19, 0 }
   0x8   : > { %p134_p3 = scmp.eq.s32.totalorder %s658_s20, 1  ;;  %p659_p5 = scmp.ge.s32.totalorder %s886_s18, 1 }
   0x9   : > { %p958_p4 = por %p1189_p1, %p41_p0  ;;  %p141_p7 = scmp.lt.s32.totalorder %s886_s18, 3 }
   0xa   : > { %p963_p6 = por %p134_p3, %p41_p0  ;;  %s888_s24 = smov [#allocation6]  }
   0xb   : > { %s1192_s21 = scalar_select %p958_p4, 1, 0 }
   0xc   : > { %s1193_s22 = scalar_select %p963_p6, 1, 0 }
   0xd   : > { %p968_p8 = pnand %p659_p5, %p141_p7  ;;  %s159_s25 = sshll.u32 %s888_s24, 4  ;;  %s972_s25 = int_to_ptr.vmem [resolvable:$true] %s159_s25 }
   0xe   : > { %s984_s27 = sadd.s32 1, %s886_s18   ;;  %s28_s28 = sadd.s32 1, %s882_s17 }
   0xf   : > { %s1194_s23 = scalar_select %p968_p8, 1, 0 }
  0x10   : > { %p695_p9 = pneg %p968_p8  ;;  %s25_s29 = ssub.s32 %s886_s18, %s984_s27 }
  0x11   : > { %s758_s6 = scalar_lea.hbm %s1187_s3, 512 }
  0x12   : > { %p979_p11 = pnand %p695_p9, %p1189_p1  ;;  %p759_p12 = scmp.ne.s32.totalorder %s1187_s3, %s758_s6 }
  0x13   : > { %p765_p5 = scmp.lt.u32.totalorder %s758_s6, %s1187_s3 }
  0x14   : > { %p760_p13 = pneg %p979_p11 }
  0x16   : > { %p761_p0 = pnand %p760_p13, %p759_p12 }
  0x18   : > { %p762_p3 = pneg %p761_p0 }
  0x1a   : > { %p767_p7 = pnand %p765_p5, %p762_p3 }
  0x1c   : > { %770 = shalt.err (!%p767_p7)
}
  0x1d   : > { %s771_s11 = scalar_lea.vmem %s972_s25, 512  ;;  %p779_p2 = scmp.lt.s32.totalorder %s972_s25, %s972_s25 }
  0x1e   : > { %p772_p9 = scmp.ne.s32.totalorder %s972_s25, %s771_s11  ;;  %p780_p6 = scmp.lt.s32.totalorder %s771_s11, %s771_s11 }
  0x20   : > { %p774_p10 = pnand %p772_p9, %p760_p13  ;;  %p781_p4 = por %p780_p6, %p779_p2 }
  0x22   : > { %p775_p1 = pneg %p774_p10 }
  0x24   : > { %p782_p8 = pnand %p781_p4, %p775_p1 }
  0x26   : > { %785 = shalt.err (!%p782_p8)
}
  0x27   : > { %s889_s12 = smov 256   ;;  %s890_s13 = smov 16  }
  0x28   : > { %698 = dma.hbm_to_vmem [thread:$0]  (!%p979_p11), %s1187_s3, 512, %s972_s25, [#allocation7], %s889_s12, %s889_s12, %s890_s13  }
  0x29   : > { %p26_p2 = scmp.eq.s32.totalorder %s25_s29, 0  ;;  %p35_p1 = scmp.ne.s32.totalorder %s882_s17, %s878_s16 }
  0x2a   : > { %p36_p4 = scmp.eq.s32.totalorder %s886_s18, 0  ;;  %p708_p6 = scmp.lt.s32.totalorder %s886_s18, 2 }
  0x2b   : > { %s1015_s24 = scalar_select %p26_p2, %s882_s17, %s28_s28  }
  0x2c   : > { %p37_p8 = por %p36_p4, %p35_p1  ;;  %p1196_p10 = scmp.eq.s32.totalorder %s949_s19, 1 }
  0x2d   : > { %s173_s5 = sand.u32 1, %s882_s17   ;;  %s677_s6 = sshll.u32 %s886_s18, 7 }
  0x2e   : > { %p1019_p12 = por %p1196_p10, %p35_p1  ;;  %s662_s7 = sshll.u32 %s173_s5, 3 }
  0x2f   : > { %s1028_s9 = scalar_lea.hbm %s1184_s0, %s677_s6  ;;  %s177_s25 = scalar_lea.vmem [#allocation3], %s662_s7 }
  0x30   : > { %s185_s28 = sshll.u32 %s177_s25, 4  ;;  %p1030_p11 = pnand %p708_p6, %p37_p8  ;;  %s1034_s28 = int_to_ptr.vmem [resolvable:$true] %s185_s28 }
  0x31   : > { %s174_s10 = scalar_lea.sflag [#allocation4], %s173_s5  ;;  %s786_s11 = scalar_lea.hbm %s1028_s9, 128 }
  0x32   : > { %p787_p13 = scmp.ne.s32.totalorder %s1028_s9, %s786_s11  ;;  %p788_p0 = pneg %p1030_p11 }
  0x33   : > { %s791_s14 = scalar_lea.hbm %s1184_s0, 256  ;;  %p792_p7 = scmp.lt.u32.totalorder %s1028_s9, %s1184_s0 }
  0x34   : > { %p789_p3 = pnand %p788_p0, %p787_p13  ;;  %p793_p9 = scmp.lt.u32.totalorder %s791_s14, %s786_s11 }
  0x35   : > { %p795_p1 = scmp.lt.u32.totalorder %s786_s11, %s1028_s9 }
  0x36   : > { %p790_p5 = pneg %p789_p3  ;;  %p794_p2 = por %p793_p9, %p792_p7 }
  0x38   : > { %p796_p4 = por %p795_p1, %p794_p2 }
  0x3a   : > { %p797_p6 = pnand %p796_p4, %p790_p5 }
  0x3c   : > { %800 = shalt.err (!%p797_p6)
}
  0x3d   : > { %s801_s5 = scalar_lea.vmem %s1034_s28, 128  ;;  %s891_s7 = smov [#allocation3]  }
  0x3e   : > { %p802_p8 = scmp.ne.s32.totalorder %s1034_s28, %s801_s5  ;;  %s806_s26 = sshll.u32 %s891_s7, 4  ;;  %s807_s26 = int_to_ptr.vmem [resolvable:$false] %s806_s26 }
  0x3f   : > { %s808_s8 = scalar_lea.vmem %s807_s26, 256  ;;  %p809_p3 = scmp.lt.s32.totalorder %s1034_s28, %s807_s26 }
  0x40   : > { %p804_p10 = pnand %p802_p8, %p788_p0  ;;  %p810_p7 = scmp.lt.s32.totalorder %s808_s8, %s801_s5 }
  0x42   : > { %p805_p13 = pneg %p804_p10  ;;  %p811_p9 = por %p810_p7, %p809_p3 }
  0x44   : > { %p812_p2 = pnand %p811_p9, %p805_p13 }
  0x46   : > { %815 = shalt.err (!%p812_p2)
}
  0x47   : > { %702 = dma.hbm_to_vmem [thread:$0]  (!%p1030_p11), %s1028_s9, 128, %s1034_s28, %s174_s10  }
  0x48   : > { %p1199_p5 = scmp.ne.s32.totalorder %s1194_s23, 0 }
  0x49   : > { %s1064_s25 = sand.u32 (!%p1199_p5), 1, %s878_s16   ;;  %p1200_p0 = scmp.ne.s32.totalorder (!%p1199_p5), %s1192_s21, 0 }
  0x4a   : > { %194 = sbr.rel (%p1199_p5) target bundleno = 477 (0x1dd), region = 36  ;;  %s666_s11 = sshll.u32 (!%p1199_p5), %s1064_s25, 3 }
  0x4b   : > { %s197_s12 = scalar_lea.sflag (!%p1199_p5), [#allocation4], %s1064_s25  ;;  %s200_s13 = scalar_lea.vmem (!%p1199_p5), [#allocation3], %s666_s11 }
  0x51   : > { %861 = dma.done.wait (%p1200_p0), %s197_s12, 128  }
  0x52   : > { %863 = vsyncadd (%p1200_p0), %s197_s12, 4294967168  ;;  %p1201_p1 = scmp.eq.s32.totalorder %s949_s19, 0 }
  0x54   : > { %865 = dma.done.wait (%p1201_p1), [#allocation7], 512   ;;  %p1202_p11 = pmov %p1201_p1 }
  0x55   : > { %v229_v0 = vld [vmem:[%s200_s13] sm:$0xff]  ;;  %s892_s23 = smov 1   ;;  %s893_s9 = smov 16   ;;  %v900_v2 = vmov 0.0   ;;  %v463_v3 = vld [vmem:[%s1186_s2] sm:$0xf]  ;;  %v237_v5 = vlaneseq }
  0x56   : > { %867 = vsyncadd (%p1202_p11), [#allocation7], 4294966784  ;;  %312 = vrot.lane.b32.xlu1 %v229_v0, %s892_s23  ;;  %342 = vst [vmem:[#allocation2 + $0x20] sm:$0xf] %v229_v0  ;;  %258 = vrot.lane.b32.xlu0 %v229_v0, %s893_s9  ;;  %v231_v1 = vcombine.high %v229_v0, %v229_v0  ;;  %s894_s28 = smov 17   ;;  %s895_s21 = smov 15  }
  0x57   : > { %s896_s29 = smov 127   ;;  %s897_s10 = smov 112   ;;  %544 = vmatprep.mubr.f32.mxu0 %v900_v2  ;;  %v901_v4 = vmov 0   ;;  %v245_v6 = vshrl.u32 %v237_v5, 7  ;;  %v1084_v7 = vand.u32 127, %v237_v5  ;;  %vm473_vm8 = vcmask 1043456  }
  0x58   : > { %343 = vst [vmem:[#allocation2 + $0x28] sm:$0xf] %v231_v1  ;;  %s898_s14 = smov 113   ;;  %s899_s20 = smov 111   ;;  %756 = vset.pattern.permute.xlu0 %v901_v4  ;;  %vm469_vm9 = vcmask 293888  }
  0x59   : > { %s668_s7 = sshll.u32 %s1064_s25, 4  ;;  %v1086_v8 = vsub.s32 0, %v245_v6  ;;  %v1088_v9 = vsub.s32 1, %v245_v6  ;;  %v320_v10 = vld [vmem:[#allocation6 + $0x3] ss:$8 sm:$0x3] }
  0x5a   : > { %233 = vrot.lane.b32.xlu0 %v229_v0, %s894_s28  ;;  %314 = vrot.lane.b32.xlu1 %v231_v1, %s892_s23  ;;  %s1080_s26 = scalar_lea.vmem [#allocation8], %s668_s7  ;;  %vm316_vm0 = vcmp.lt.s32.totalorder %v1084_v7, 1  ;;  %v242_v15 = vld [vmem:[#allocation6] ss:$8 sm:$0x3]  ;;  %vm239_vm1 = vcmp.lt.s32.totalorder %v1084_v7, 17 }
  0x5b   : > { %553 = vst [vmem:[%s1080_s26] sm:$0xf] %v229_v0  ;;  %554 = vst [vmem:[%s1080_s26 + $0x8] sm:$0xf] %v231_v1  ;;  %v325_v13 = vrot.slane %v320_v10, %v1086_v8  ;;  %v329_v14 = vrot.slane %v320_v10, %v1088_v9  ;;  %v266_v16 = vld [vmem:[#allocation6 + $0x1] ss:$8 sm:$0x3]  ;;  %v247_v21 = vrot.slane %v242_v15, %v1086_v8 }
  0x5c   : > { %vm262_vm2 = vcmp.lt.s32.totalorder %v1084_v7, 16  ;;  %v251_v22 = vrot.slane %v242_v15, %v1088_v9  ;;  %v296_v23 = vld [vmem:[#allocation6 + $0x2] ss:$8 sm:$0x3]  ;;  %v271_v26 = vrot.slane %v266_v16, %v1086_v8  ;;  %v275_v27 = vrot.slane %v266_v16, %v1088_v9  ;;  %s678_s12 = sshll.u32 %s949_s19, 8  ;;  %s578_s13 = sshll.u32 %s1080_s26, 4  ;;  %s1140_s13 = int_to_ptr.vmem [resolvable:$true] %s578_s13 }
  0x5d   : > { %vm292_vm3 = vcmp.lt.s32.totalorder %v1084_v7, 15  ;;  %v301_v32 = vrot.slane %v296_v23, %v1086_v8  ;;  %v305_v33 = vrot.slane %v296_v23, %v1088_v9  ;;  %v352_v42 = vld [vmem:[#allocation6 + $0x5] ss:$8 sm:$0x3]  ;;  %vm348_vm4 = vcmp.lt.s32.totalorder %v1084_v7, 127  ;;  %s902_s19 = smov [#allocation8]  }
  0x5e   : > { %235 = vrot.lane.b32.xlu1 %v231_v1, %s894_s28  ;;  %260 = vrot.lane.b32.xlu0 %v231_v1, %s893_s9  ;;  %v357_v51 = vrot.slane %v352_v42, %v1086_v8  ;;  %v361_v52 = vrot.slane %v352_v42, %v1088_v9  ;;  %v406_v53 = vld [vmem:[#allocation6 + $0x7] ss:$8 sm:$0x3]  ;;  %vm402_vm5 = vcmp.lt.s32.totalorder %v1084_v7, 112  ;;  %vm378_vm6 = vcmp.lt.s32.totalorder %v1084_v7, 113  ;;  %s1138_s28 = scalar_lea.hbm %s1188_s4, %s678_s12 }
  0x5f   : > { %v411_v60 = vrot.slane %v406_v53, %v1086_v8  ;;  %v415_v61 = vrot.slane %v406_v53, %v1088_v9  ;;  %v382_v62 = vld [vmem:[#allocation6 + $0x6] ss:$8 sm:$0x3]  ;;  %vm432_vm7 = vcmp.lt.s32.totalorder %v1084_v7, 111 }
  0x60   : > { %v387_v10 = vrot.slane %v382_v62, %v1086_v8 }
  0x62   : > { %290 = vrot.lane.b32.xlu1 %v231_v1, %s895_s21  ;;  %288 = vrot.lane.b32.xlu0 %v229_v0, %s895_s21  ;;  %s564_s21 = scalar_lea.sflag [#allocation5], %s1064_s25 }
  0x66   : > { %346 = vrot.lane.b32.xlu1 %v231_v1, %s896_s29  ;;  %344 = vrot.lane.b32.xlu0 %v229_v0, %s896_s29  ;;  %s816_s29 = scalar_lea.vmem %s1140_s13, 256 }
  0x67   : > { %p817_p4 = scmp.ne.s32.totalorder %s1140_s13, %s816_s29 }
  0x69   : > { %p818_p6 = pnand %p817_p4, %p1019_p12 }
  0x6a   : > { %400 = vrot.lane.b32.xlu1 %v231_v1, %s897_s10  ;;  %398 = vrot.lane.b32.xlu0 %v229_v0, %s897_s10  ;;  %s820_s10 = sshll.u32 %s902_s19, 4  ;;  %s821_s10 = int_to_ptr.vmem [resolvable:$false] %s820_s10 }
  0x6b   : > { %p819_p8 = pneg %p818_p6  ;;  %p823_p10 = scmp.lt.s32.totalorder %s1140_s13, %s821_s10 }
  0x6e   : > { %376 = vrot.lane.b32.xlu1 %v231_v1, %s898_s14  ;;  %374 = vrot.lane.b32.xlu0 %v229_v0, %s898_s14  ;;  %s822_s14 = scalar_lea.vmem %s821_s10, 512 }
  0x6f   : > { %p824_p13 = scmp.lt.s32.totalorder %s822_s14, %s816_s29 }
  0x71   : > { %p825_p3 = por %p824_p13, %p823_p10 }
  0x72   : > { %430 = vrot.lane.b32.xlu1 %v231_v1, %s899_s20  ;;  %428 = vrot.lane.b32.xlu0 %v229_v0, %s899_s20 }
  0x73   : > { %p826_p7 = pnand %p825_p3, %p819_p8 }
  0x76   : > { %466 = vperm.xlu0 %756, %v463_v3  }
  0xc8   : > { %v313_v11 = vpop.permute.xlu1 %312  ;;  %v259_v12 = vpop.permute.xlu0 %258 }
  0xcc   : > { %v234_v17 = vpop.permute.xlu0 %233  ;;  %v315_v18 = vpop.permute.xlu1 %314 }
  0xcd   : > { %v317_v19 = vsel %vm316_vm0, %v313_v11, %v315_v18  ;;  %v318_v20 = vsel %vm316_vm0, %v315_v18, %v313_v11  ;;  %v391_v11 = vrot.slane %v382_v62, %v1088_v9 }
  0xce   : > { %v332_v24 = vmul.f32 %v325_v13, %v318_v20  ;;  %v333_v25 = vmul.f32 %v329_v14, %v317_v19  ;;  %v436_v13 = vld [vmem:[#allocation6 + $0x10] ss:$8 sm:$0x3] }
  0xd0   : > { %v336_v28 = vrot.slane %v332_v24, 4  ;;  %v337_v29 = vrot.slane %v333_v25, 4  ;;  %v236_v30 = vpop.permute.xlu1 %235  ;;  %v261_v31 = vpop.permute.xlu0 %260 }
  0xd1   : > { %v240_v34 = vsel %vm239_vm1, %v234_v17, %v236_v30  ;;  %v241_v35 = vsel %vm239_vm1, %v236_v30, %v234_v17  ;;  %v263_v36 = vsel %vm262_vm2, %v259_v12, %v261_v31  ;;  %v264_v37 = vsel %vm262_vm2, %v261_v31, %v259_v12 }
  0xd2   : > { %340 = vst [vmem:[#allocation2 + $0x10] sm:$0xf0] %v336_v28  ;;  %341 = vst [vmem:[#allocation2 + $0x18] sm:$0xf0] %v337_v29  ;;  %v254_v38 = vmul.f32 %v247_v21, %v241_v35  ;;  %v255_v39 = vmul.f32 %v251_v22, %v240_v34  ;;  %v278_v40 = vmul.f32 %v271_v26, %v264_v37 }
  0xd3   : > { %v279_v41 = vmul.f32 %v275_v27, %v263_v36  ;;  %v441_v27 = vrot.slane %v436_v13, %v1086_v8  ;;  %v445_v28 = vrot.slane %v436_v13, %v1088_v9 }
  0xd4   : > { %256 = vst [vmem:[#allocation2] sm:$0xf] %v254_v38  ;;  %257 = vst [vmem:[#allocation2 + $0x8] sm:$0xf] %v255_v39  ;;  %v282_v43 = vrot.slane %v278_v40, 4  ;;  %v291_v45 = vpop.permute.xlu1 %290  ;;  %v289_v46 = vpop.permute.xlu0 %288 }
  0xd5   : > { %v283_v44 = vrot.slane %v279_v41, 4  ;;  %v293_v47 = vsel %vm292_vm3, %v289_v46, %v291_v45  ;;  %v294_v48 = vsel %vm292_vm3, %v291_v45, %v289_v46  ;;  %v452_v40 = vld [vmem:[%s1185_s1] sm:$0xf] }
  0xd6   : > { %286 = vst [vmem:[#allocation2] sm:$0xf0] %v282_v43  ;;  %v308_v49 = vmul.f32 %v301_v32, %v294_v48  ;;  %v309_v50 = vmul.f32 %v305_v33, %v293_v47 }
  0xd7   : > { %287 = vst [vmem:[#allocation2 + $0x8] sm:$0xf0] %v283_v44 }
  0xd8   : > { %310 = vst [vmem:[#allocation2 + $0x10] sm:$0xf] %v308_v49  ;;  %311 = vst [vmem:[#allocation2 + $0x18] sm:$0xf] %v309_v50  ;;  %v347_v54 = vpop.permute.xlu1 %346  ;;  %v345_v55 = vpop.permute.xlu0 %344 }
  0xd9   : > { %v349_v56 = vsel %vm348_vm4, %v345_v55, %v347_v54  ;;  %v350_v57 = vsel %vm348_vm4, %v347_v54, %v345_v55 }
  0xda   : > { %v364_v58 = vmul.f32 %v357_v51, %v349_v56  ;;  %v365_v59 = vmul.f32 %v361_v52, %v350_v57 }
  0xdc   : > { %v368_v63 = vrot.slane %v364_v58, 4  ;;  %v369_v0 = vrot.slane %v365_v59, 4  ;;  %v401_v1 = vpop.permute.xlu1 %400  ;;  %v399_v2 = vpop.permute.xlu0 %398 }
  0xdd   : > { %v403_v3 = vsel %vm402_vm5, %v399_v2, %v401_v1  ;;  %v404_v4 = vsel %vm402_vm5, %v401_v1, %v399_v2  ;;  %v453_v15 = vld [vmem:[#allocation2] sm:$0xff] }
  0xde   : > { %372 = vst [vmem:[#allocation2 + $0x20] sm:$0xf0] %v368_v63  ;;  %373 = vst [vmem:[#allocation2 + $0x28] sm:$0xf0] %v369_v0  ;;  %v418_v5 = vmul.f32 %v411_v60, %v403_v3  ;;  %v419_v6 = vmul.f32 %v415_v61, %v404_v4  ;;  %v454_v12 = vld [vmem:[#allocation2 + $0x8] sm:$0xff] }
  0xdf   : > { %v456_v14 = vld [vmem:[#allocation2 + $0x18] sm:$0xff]  ;;  %v455_v16 = vld [vmem:[#allocation2 + $0x10] sm:$0xff] }
  0xe0   : > { %v422_v17 = vrot.slane %v418_v5, 4  ;;  %v423_v18 = vrot.slane %v419_v6, 4  ;;  %v377_v19 = vpop.permute.xlu1 %376  ;;  %v375_v20 = vpop.permute.xlu0 %374  ;;  %v679_v21 = vpack.c.bf16 %v456_v14, %v454_v12  ;;  %v681_v22 = vpack.c.bf16 %v455_v16, %v453_v15 }
  0xe1   : > { %v379_v23 = vsel %vm378_vm6, %v375_v20, %v377_v19  ;;  %v380_v24 = vsel %vm378_vm6, %v377_v19, %v375_v20 }
  0xe2   : > { %426 = vst [vmem:[#allocation2 + $0x30] sm:$0xf0] %v422_v17  ;;  %427 = vst [vmem:[#allocation2 + $0x38] sm:$0xf0] %v423_v18  ;;  %v394_v25 = vmul.f32 %v387_v10, %v379_v23  ;;  %v395_v26 = vmul.f32 %v391_v11, %v380_v24  ;;  %680 = vmatprep.subr.bf16.mxu0 %v679_v21 }
  0xe3   : > { %682 = vmatpush1.bf16.msra.mxu0 %v681_v22 }
  0xe4   : > { %396 = vst [vmem:[#allocation2 + $0x30] sm:$0xf] %v394_v25  ;;  %397 = vst [vmem:[#allocation2 + $0x38] sm:$0xf] %v395_v26  ;;  %v431_v29 = vpop.permute.xlu1 %430  ;;  %v429_v30 = vpop.permute.xlu0 %428 }
  0xe5   : > { %v433_v31 = vsel %vm432_vm7, %v429_v30, %v431_v29  ;;  %v434_v32 = vsel %vm432_vm7, %v431_v29, %v429_v30  ;;  %v458_v7 = vld [vmem:[#allocation2 + $0x28] sm:$0xff]  ;;  %v457_v36 = vld [vmem:[#allocation2 + $0x20] sm:$0xff] }
  0xe6   : > { %v448_v33 = vmul.f32 %v441_v27, %v433_v31  ;;  %v449_v34 = vmul.f32 %v445_v28, %v434_v32 }
  0xe8   : > { %450 = vst [vmem:[#allocation2 + $0x40] sm:$0xf] %v448_v33  ;;  %451 = vst [vmem:[#allocation2 + $0x48] sm:$0xf] %v449_v34 }
  0xeb   : > { %v460_v35 = vld [vmem:[#allocation2 + $0x38] sm:$0xff]  ;;  %v459_v37 = vld [vmem:[#allocation2 + $0x30] sm:$0xff] }
  0xec   : > { %v683_v38 = vpack.c.bf16 %v460_v35, %v458_v7  ;;  %v685_v39 = vpack.c.bf16 %v459_v37, %v457_v36 }
  0xee   : > { %684 = vmatprep.subr.bf16.mxu0 %v683_v38 }
  0xef   : > { %686 = vmatpush1.bf16.msra.mxu0 %v685_v39  ;;  %v462_v8 = vld [vmem:[#allocation2 + $0x48] sm:$0xf]  ;;  %v461_v9 = vld [vmem:[#allocation2 + $0x40] sm:$0xf] }
  0xf0   : > { %669 = vmatprep.subr.msk.mxu0 %vm473_vm8, %v462_v8 }
  0xf3   : > { %670 = vmatpush1.msk.msra.mxu0 %vm473_vm8, %v461_v9 }
  0xf4   : > { %671 = vmatmul.mubr.msk.f32.vlgmr.msra.gmra.mrb[0].mxu0 %vm469_vm9, %v452_v40 }
  0xf5   : > { %v467_v41 = vpop.permute.xlu0 %466 }
 0x1c7   : > { %v546_v42 = vpop.f32.mrb[0].mxu0 }
 0x1c8   : > { %v547_v43 = vadd.f32 %v546_v42, %v467_v41  ;;  %v548_v44 = vpop.f32.mrb[1].mxu0 }
 0x1c9   : > { %v549_v45 = vadd.f32 %v548_v44, %v467_v41 }
 0x1ca   : > { %v551_v46 = vmax.f32 %v547_v43, 0.0 }
 0x1cb   : > { %v552_v47 = vmax.f32 %v549_v45, 0.0 }
 0x1cc   : > { %v557_v48 = vrot.slane %v551_v46, 4 }
 0x1cd   : > { %v558_v49 = vrot.slane %v552_v47, 4 }
 0x1ce   : > { %561 = vst [vmem:[%s1080_s26] sm:$0xf0] %v557_v48 }
 0x1cf   : > { %562 = vst [vmem:[%s1080_s26 + $0x8] sm:$0xf0] %v558_v49 }
 0x1d0   : > { %829 = shalt.err (!%p826_p7)
}
 0x1d1   : > { %s830_s25 = scalar_lea.hbm %s1138_s28, 256  ;;  %s834_s5 = scalar_lea.hbm %s1188_s4, 512 }
 0x1d2   : > { %p831_p9 = scmp.ne.s32.totalorder %s1138_s28, %s830_s25  ;;  %p835_p0 = scmp.lt.u32.totalorder %s1138_s28, %s1188_s4 }
 0x1d3   : > { %p836_p1 = scmp.lt.u32.totalorder %s834_s5, %s830_s25  ;;  %p838_p4 = scmp.lt.u32.totalorder %s830_s25, %s1138_s28 }
 0x1d4   : > { %p832_p2 = pnand %p831_p9, %p1019_p12 }
 0x1d5   : > { %p837_p11 = por %p836_p1, %p835_p0 }
 0x1d6   : > { %p833_p5 = pneg %p832_p2 }
 0x1d7   : > { %p839_p6 = por %p838_p4, %p837_p11 }
 0x1d9   : > { %p840_p8 = pnand %p839_p6, %p833_p5 }
 0x1db   : > { %843 = shalt.err (!%p840_p8)
}
 0x1dc   : > { %693 = dma.vmem_to_hbm [thread:$0]  (%p1019_p12), %s1140_s13, 256, %s1138_s28, %s564_s21  }
 0x1dd PF: > { %s590_s8 = sand.u32 1, %s874_s15   ;;  %p1203_p10 = scmp.ne.s32.totalorder %s1193_s22, 0 }
 0x1de   : > { %p1204_p13 = scmp.ge.s32.totalorder %s886_s18, 2  ;;  %s591_s11 = scalar_lea.sflag [#allocation5], %s590_s8 }
 0x1e0   : > { %p704_p3 = pnand %p1204_p13, %p1203_p10 }
 0x1e2   : > { %869 = dma.done.wait (!%p704_p3), %s591_s11, 256  }
 0x1e3   : > { %871 = vsyncadd (!%p704_p3), %s591_s11, 4294967040  ;;  %p18_p7 = scmp.ge.s32.totalorder %s984_s27, 4   ;;  %s1205_s15 = smov %s878_s16 }
 0x1e4   : > { %s1206_s16 = smov %s882_s17  ;;  %s1207_s17 = smov %s1015_s24 }
 0x1e5   : > { %s1208_s18 = smov %s984_s27  ;;  %20 = sbr.rel (!%p18_p7) target bundleno = 6 (0x6), region = 92 }
 0x1ec   :  { %596 = vsyncpa [#allocation4], 1 }
 0x1ed   :  { %598 = vsyncpa [#allocation4 + $0x1], 1 }
 0x1ee   :  { %599 = vsyncpa [#allocation7], 1 }
 0x1ef   :  { %600 = vsyncpa [#allocation5], 1 }
 0x1f0   :  { %602 = vsyncpa [#allocation5 + $0x1], 1 }

</bundles_post_ra>
